<compile_context>
chip_gen: v5e
topology: v5e:2x2
jax: 0.10.0
libtpu: 0.0.40
codegen_flags: <defaults>
</compile_context>

<pallas_src>
import functools

import jax
import jax.numpy as jnp
from jax.experimental import pallas as pl
from jax.experimental.pallas import tpu as pltpu


_TARGET_BLOCK_BYTES = 1 << 20          # ~1 MiB x-blocks for the streaming pass
_VMEM_LIMIT_BYTES = 32 * 1024 * 1024   # explicit, valid on v5e/v6e/v7x


def _round_up(n, m):
    return ((n + m - 1) // m) * m


def _choose_l_tile(lp, rows, itemsize, target):
    """Largest multiple of 128 dividing lp with rows*t*itemsize <= target."""
    best, t = 128, 128
    while t <= lp:
        if lp % t == 0 and rows * t * itemsize <= target:
            best = t
        t += 128
    return best


# ----------------------------- pass 1: gate ---------------------------------
def _gate_kernel(x_ref, w_ref, attn_ref, sum_ref, max_ref, *,
                 kernel_size, c_total, c_block, needs_c_mask, l_real):
    """Channel mean/max reduction (grid axis 1) + 7-tap conv + sigmoid.

    x_ref:    (1, TC, Lp) block of x (batch b, channel tile c), native dtype
    w_ref:    (2K,) f32 conv weights in SMEM: [avg taps..., max taps...]
    attn_ref: (1, 1, Lp) f32 output gate (resident across the C axis)
    sum/max:  (1, Lp) f32 VMEM scratch accumulators
    """
    c_idx = pl.program_id(1)

    @pl.when(c_idx == 0)
    def _init():
        sum_ref[...] = jnp.zeros_like(sum_ref)
        max_ref[...] = jnp.full_like(max_ref, -jnp.inf)

    # Cast once per tile (needed for f32 sum accumulation); cross-sublane reduce.
    xf = x_ref[0].astype(jnp.float32)                      # (TC, Lp)
    sum_ref[...] += jnp.sum(xf, axis=0, keepdims=True)

    if needs_c_mask:
        # Zero-padded channel rows must not win the max (true for all-negative x).
        row = jax.lax.broadcasted_iota(jnp.int32, xf.shape, 0) + c_idx * c_block
        xf_for_max = jnp.where(row < c_total, xf, -jnp.inf)
    else:
        xf_for_max = xf
    max_ref[...] = jnp.maximum(max_ref[...],
                               jnp.max(xf_for_max, axis=0, keepdims=True))

    @pl.when(c_idx == pl.num_programs(1) - 1)
    def _finalize():
        K = kernel_size
        pad = (K - 1) // 2
        avg = sum_ref[...] * (1.0 / c_total)               # (1, Lp), true-C divisor
        mx = max_ref[...]
        lp = avg.shape[1]
        lane = jax.lax.broadcasted_iota(jnp.int32, avg.shape, 1)

        # Hoist the 2K SMEM scalar reads out of the tap loop.
        w_avg = [w_ref[k] for k in range(K)]
        w_max = [w_ref[K + k] for k in range(K)]

        # "Same" cross-correlation with zero padding, one XLU roll per tap plus a
        # <=pad-lane edge mask (kills the circular wrap-around / out-of-range taps).
        acc = jnp.zeros_like(avg)
        for k in range(K):                                 # K in {3, 7}: static unroll
            shift = pad - k
            if shift == 0:
                a_k, m_k = avg, mx
            else:
                a_k = pltpu.roll(avg, shift % lp, 1)
                m_k = pltpu.roll(mx, shift % lp, 1)
            valid = (lane >= shift) & (lane < l_real + shift)
            acc = acc + jnp.where(valid, w_avg[k] * a_k + w_max[k] * m_k, 0.0)

        attn_ref[0] = jax.nn.sigmoid(acc)                  # EUP transcendental


# ----------------------------- pass 2: apply ---------------------------------
def _apply_gate_kernel(x_ref, attn_ref, o_ref):
    """out = x * gate, computed in x's native dtype (bf16 stays bf16)."""
    gate = attn_ref[0].astype(o_ref.dtype)                 # (1, TL)
    o_ref[0] = x_ref[0] * gate                             # broadcast over channels


# ------------------------------- wrapper -------------------------------------
def spatial_attention_pallas(x, conv_weight, *,
                             target_block_bytes=_TARGET_BLOCK_BYTES):
    """x: (B, C, L). conv_weight: torch Conv1d layout (1, 2, K) or (2, K)."""
    B, C, L = x.shape
    w = jnp.asarray(conv_weight, jnp.float32).reshape(2, -1)
    K = int(w.shape[1])
    assert K in (3, 7), "kernel size must be 3 or 7"
    w_flat = w.reshape(-1)                                  # (2K,): 1-D SMEM table

    itemsize = jnp.dtype(x.dtype).itemsize
    sub = 8 if itemsize >= 4 else (16 if itemsize == 2 else 32)

    # Pad L to a lane-dense multiple of 128 (exactly matches Conv1d zero padding).
    Lp = _round_up(L, 128)

    # Channel tile for the reduction pass: multiple of `sub`, ~target bytes per block.
    tc_target = max(sub, (target_block_bytes // max(1, Lp * itemsize)) // sub * sub)
    if tc_target >= C:
        TC, Cp = C, C                                       # full-dim block, no pad
    else:
        TC = tc_target
        Cp = _round_up(C, TC)                               # zero-pad channels
    nC = Cp // TC

    # Length tile for the streaming/gating pass.
    TL = _choose_l_tile(Lp, TC, itemsize, target_block_bytes)
    nL = Lp // TL

    if (Cp, Lp) != (C, L):
        x_p = jnp.pad(x, ((0, 0), (0, Cp - C), (0, Lp - L)))
    else:
        x_p = x

    gate_kernel = functools.partial(
        _gate_kernel, kernel_size=K, c_total=C, c_block=TC,
        needs_c_mask=(Cp != C), l_real=L)

    # Pass 1: gate = sigmoid(conv([mean_c, max_c]))  -> (B, 1, Lp) f32.
    # Grid: batch parallel (>=2 steps at B>=2), channel-tile reduction innermost.
    # NOTE: this pass keeps full L per block (the 7-tap conv needs the whole row);
    # its blocks are (1, TC, Lp) with TC sized to the byte target.
    attn = pl.pallas_call(
        gate_kernel,
        out_shape=jax.ShapeDtypeStruct((B, 1, Lp), jnp.float32),
        grid_spec=pltpu.PrefetchScalarGridSpec(
            num_scalar_prefetch=0,
            grid=(B, nC),
            in_specs=[
                pl.BlockSpec((1, TC, Lp), lambda b, c: (b, c, 0)),
                pl.BlockSpec(memory_space=pltpu.MemorySpace.SMEM),
            ],
            out_specs=pl.BlockSpec((1, 1, Lp), lambda b, c: (b, 0, 0)),
            scratch_shapes=[pltpu.VMEM((1, Lp), jnp.float32),
                            pltpu.VMEM((1, Lp), jnp.float32)],
        ),
        compiler_params=pltpu.CompilerParams(
            dimension_semantics=("parallel", "arbitrary"),
            vmem_limit_bytes=_VMEM_LIMIT_BYTES),
    )(x_p, w_flat)

    # Pass 2: out = x * gate, fully elementwise; ~target-byte lane-dense blocks,
    # all grid axes parallel (v7x megacore sharding), unmasked 128-multiple stores.
    out_p = pl.pallas_call(
        _apply_gate_kernel,
        out_shape=jax.ShapeDtypeStruct((B, Cp, Lp), x.dtype),
        grid_spec=pltpu.PrefetchScalarGridSpec(
            num_scalar_prefetch=0,
            grid=(B, nC, nL),
            in_specs=[
                pl.BlockSpec((1, TC, TL), lambda b, c, l: (b, c, l)),
                pl.BlockSpec((1, 1, TL), lambda b, c, l: (b, 0, l)),
            ],
            out_specs=pl.BlockSpec((1, TC, TL), lambda b, c, l: (b, c, l)),
        ),
        compiler_params=pltpu.CompilerParams(
            dimension_semantics=("parallel", "parallel", "parallel"),
            vmem_limit_bytes=_VMEM_LIMIT_BYTES),
    )(x_p, attn)

    if (Cp, Lp) != (C, L):
        out_p = out_p[:, :C, :L]
    return out_p


# ------------------------------ reference ------------------------------------
def spatial_attention_reference(x, conv_weight):
    K = conv_weight.shape[-1]
    pad = (K - 1) // 2
    xf = x.astype(jnp.float32)
    avg = jnp.mean(xf, axis=1, keepdims=True)
    mx = jnp.max(xf, axis=1, keepdims=True)
    stacked = jnp.concatenate([avg, mx], axis=1)            # (B, 2, L)
    logits = jax.lax.conv_general_dilated(
        stacked, jnp.asarray(conv_weight, jnp.float32).reshape(1, 2, K),
        window_strides=(1,), padding=[(pad, pad)],
        dimension_numbers=("NCH", "OIH", "NCH"),
        precision=jax.lax.Precision.HIGHEST)                 # (B, 1, L)
    return (xf * jax.nn.sigmoid(logits)).astype(x.dtype)


if __name__ == "__main__":
    key = jax.random.PRNGKey(0)
    k1, k2, k3, k4 = jax.random.split(key, 4)
    K = 7
    bound = 1.0 / (2 * K) ** 0.5                             # torch Conv1d default init
    w = jax.random.uniform(k1, (1, 2, K), jnp.float32, -bound, bound)

    # Case 1: f32, aligned shapes (C multiple of 8, L multiple of 128).
    x1 = jax.random.normal(k2, (2, 8, 256), jnp.float32)
    out1 = spatial_attention_pallas(x1, w)
    jax.block_until_ready(out1)
    ref1 = spatial_attention_reference(x1, w)
    assert out1.shape == x1.shape and out1.dtype == x1.dtype
    assert jnp.allclose(out1, ref1, atol=1e-5, rtol=1e-5), "f32 mismatch"

    # Case 2: bf16, unaligned C/L (exercises wrapper padding + native-dtype gating).
    x2 = jax.random.normal(k3, (2, 6, 300), jnp.float32).astype(jnp.bfloat16)
    out2 = spatial_attention_pallas(x2, w)
    jax.block_until_ready(out2)
    ref2 = spatial_attention_reference(x2, w)
    assert out2.shape == x2.shape and out2.dtype == x2.dtype
    assert jnp.allclose(out2.astype(jnp.float32), ref2.astype(jnp.float32),
                        atol=3e-2, rtol=3e-2), "bf16 mismatch"

    # Case 3: force the tiled path at small shapes (C tiling + pad mask, 2 L-tiles,
    # multi-step channel reduction, conv edge masks with L == Lp).
    x3 = jax.random.normal(k4, (2, 20, 512), jnp.float32)
    out3 = spatial_attention_pallas(x3, w, target_block_bytes=8192)
    jax.block_until_ready(out3)
    ref3 = spatial_attention_reference(x3, w)
    assert out3.shape == x3.shape
    assert jnp.allclose(out3, ref3, atol=1e-5, rtol=1e-5), "tiled-path mismatch"

    print("KERNEL_OK")
</pallas_src>

<mosaic_0001>
module attributes {stable_mosaic.version = 11 : i64} {
  func.func @_gate_kernel(%arg0: i32, %arg1: i32, %arg2: memref<1x8x256xf32, #tpu.memory_space<vmem>>, %arg3: memref<14xf32, #tpu.memory_space<smem>>, %arg4: memref<1x1x256xf32, #tpu.memory_space<vmem>>, %arg5: memref<1x256xf32, #tpu.memory_space<vmem>>, %arg6: memref<1x256xf32, #tpu.memory_space<vmem>>) attributes {dimension_semantics = [#tpu.dimension_semantics<parallel>, #tpu.dimension_semantics<arbitrary>], iteration_bounds = array<i64: 2, 1>, scalar_prefetch = 0 : i64, scratch_operands = 2 : i64, tpu.core_type = #tpu.core_type<tc>, window_params = [{transform_indices = @transform_0, window_bounds = array<i64: 1, 8, 256>}, {transform_indices = @transform_1, window_bounds = array<i64: 14>}, {transform_indices = @transform_2, window_bounds = array<i64: 1, 1, 256>}]} {
    %c0_i32 = arith.constant 0 : i32
    %0 = arith.cmpi eq, %arg1, %c0_i32 : i32
    %1 = arith.extui %0 : i1 to i32
    %c0_i32_0 = arith.constant 0 : i32
    %2 = arith.cmpi ne, %1, %c0_i32_0 : i32
    scf.if %2 {
      %cst_14 = arith.constant 0.000000e+00 : f32
      %18 = vector.broadcast %cst_14 : f32 to vector<1x256xf32>
      %c0_15 = arith.constant 0 : index
      %c0_16 = arith.constant 0 : index
      %19 = vector.load %arg5[%c0_15, %c0_16] : memref<1x256xf32, #tpu.memory_space<vmem>>, vector<1x256xf32>
      tpu.vector_store %arg5[%c0_15, %c0_16], %18 {strides = array<i32>} : memref<1x256xf32, #tpu.memory_space<vmem>>, vector<1x256xf32>,
      %cst_17 = arith.constant 0xFF800000 : f32
      %20 = vector.broadcast %cst_17 : f32 to vector<1x256xf32>
      %c0_18 = arith.constant 0 : index
      %c0_19 = arith.constant 0 : index
      %21 = vector.load %arg6[%c0_18, %c0_19] : memref<1x256xf32, #tpu.memory_space<vmem>>, vector<1x256xf32>
      tpu.vector_store %arg6[%c0_18, %c0_19], %20 {strides = array<i32>} : memref<1x256xf32, #tpu.memory_space<vmem>>, vector<1x256xf32>,
    } else {
    }
    %c0 = arith.constant 0 : index
    %c0_1 = arith.constant 0 : index
    %c0_2 = arith.constant 0 : index
    %3 = vector.load %arg2[%c0, %c0_1, %c0_2] : memref<1x8x256xf32, #tpu.memory_space<vmem>>, vector<1x8x256xf32>
    %4 = vector.shape_cast %3 : vector<1x8x256xf32> to vector<8x256xf32>
    %c0_3 = arith.constant 0 : index
    %c0_4 = arith.constant 0 : index
    %5 = vector.load %arg5[%c0_3, %c0_4] : memref<1x256xf32, #tpu.memory_space<vmem>>, vector<1x256xf32>
    %cst = arith.constant dense<0.000000e+00> : vector<256xf32>
    %6 = vector.multi_reduction <add>, %4, %cst [0] : vector<8x256xf32> to vector<256xf32>
    %7 = vector.shape_cast %6 : vector<256xf32> to vector<1x256xf32>
    %8 = arith.addf %5, %7 : vector<1x256xf32>
    %c0_5 = arith.constant 0 : index
    %c0_6 = arith.constant 0 : index
    %9 = vector.load %arg5[%c0_5, %c0_6] : memref<1x256xf32, #tpu.memory_space<vmem>>, vector<1x256xf32>
    tpu.vector_store %arg5[%c0_5, %c0_6], %8 {strides = array<i32>} : memref<1x256xf32, #tpu.memory_space<vmem>>, vector<1x256xf32>,
    %c0_7 = arith.constant 0 : index
    %c0_8 = arith.constant 0 : index
    %10 = vector.load %arg6[%c0_7, %c0_8] : memref<1x256xf32, #tpu.memory_space<vmem>>, vector<1x256xf32>
    %cst_9 = arith.constant dense<0xFF800000> : vector<256xf32>
    %11 = vector.multi_reduction <maximumf>, %4, %cst_9 [0] : vector<8x256xf32> to vector<256xf32>
    %12 = vector.shape_cast %11 : vector<256xf32> to vector<1x256xf32>
    %13 = arith.maximumf %10, %12 : vector<1x256xf32>
    %c0_10 = arith.constant 0 : index
    %c0_11 = arith.constant 0 : index
    %14 = vector.load %arg6[%c0_10, %c0_11] : memref<1x256xf32, #tpu.memory_space<vmem>>, vector<1x256xf32>
    tpu.vector_store %arg6[%c0_10, %c0_11], %13 {strides = array<i32>} : memref<1x256xf32, #tpu.memory_space<vmem>>, vector<1x256xf32>,
    %c0_i32_12 = arith.constant 0 : i32
    %15 = arith.cmpi eq, %arg1, %c0_i32_12 : i32
    %16 = arith.extui %15 : i1 to i32
    %c0_i32_13 = arith.constant 0 : i32
    %17 = arith.cmpi ne, %16, %c0_i32_13 : i32
    scf.if %17 {
      %c0_14 = arith.constant 0 : index
      %c0_15 = arith.constant 0 : index
      %18 = vector.load %arg5[%c0_14, %c0_15] : memref<1x256xf32, #tpu.memory_space<vmem>>, vector<1x256xf32>
      %cst_16 = arith.constant 1.250000e-01 : f32
      %19 = vector.broadcast %cst_16 : f32 to vector<1x256xf32>
      %20 = arith.mulf %18, %19 : vector<1x256xf32>
      %c0_17 = arith.constant 0 : index
      %c0_18 = arith.constant 0 : index
      %21 = vector.load %arg6[%c0_17, %c0_18] : memref<1x256xf32, #tpu.memory_space<vmem>>, vector<1x256xf32>
      %22 = tpu.iota {dimensions = array<i32: 1>} : vector<1x256xi32>
      %c0_19 = arith.constant 0 : index
      %23 = memref.load %arg3[%c0_19] : memref<14xf32, #tpu.memory_space<smem>>
      %c1 = arith.constant 1 : index
      %24 = memref.load %arg3[%c1] : memref<14xf32, #tpu.memory_space<smem>>
      %c2 = arith.constant 2 : index
      %25 = memref.load %arg3[%c2] : memref<14xf32, #tpu.memory_space<smem>>
      %c3 = arith.constant 3 : index
      %26 = memref.load %arg3[%c3] : memref<14xf32, #tpu.memory_space<smem>>
      %c4 = arith.constant 4 : index
      %27 = memref.load %arg3[%c4] : memref<14xf32, #tpu.memory_space<smem>>
      %c5 = arith.constant 5 : index
      %28 = memref.load %arg3[%c5] : memref<14xf32, #tpu.memory_space<smem>>
      %c6 = arith.constant 6 : index
      %29 = memref.load %arg3[%c6] : memref<14xf32, #tpu.memory_space<smem>>
      %c7 = arith.constant 7 : index
      %30 = memref.load %arg3[%c7] : memref<14xf32, #tpu.memory_space<smem>>
      %c8 = arith.constant 8 : index
      %31 = memref.load %arg3[%c8] : memref<14xf32, #tpu.memory_space<smem>>
      %c9 = arith.constant 9 : index
      %32 = memref.load %arg3[%c9] : memref<14xf32, #tpu.memory_space<smem>>
      %c10 = arith.constant 10 : index
      %33 = memref.load %arg3[%c10] : memref<14xf32, #tpu.memory_space<smem>>
      %c11 = arith.constant 11 : index
      %34 = memref.load %arg3[%c11] : memref<14xf32, #tpu.memory_space<smem>>
      %c12 = arith.constant 12 : index
      %35 = memref.load %arg3[%c12] : memref<14xf32, #tpu.memory_space<smem>>
      %c13 = arith.constant 13 : index
      %36 = memref.load %arg3[%c13] : memref<14xf32, #tpu.memory_space<smem>>
      %cst_20 = arith.constant 0.000000e+00 : f32
      %37 = vector.broadcast %cst_20 : f32 to vector<1x256xf32>
      %c3_i32 = arith.constant 3 : i32
      %38 = tpu.dynamic_rotate %20 by %c3_i32 dim 1 : vector<1x256xf32>, i32 -> vector<1x256xf32>
      %c3_i32_21 = arith.constant 3 : i32
      %39 = tpu.dynamic_rotate %21 by %c3_i32_21 dim 1 : vector<1x256xf32>, i32 -> vector<1x256xf32>
      %c3_i32_22 = arith.constant 3 : i32
      %40 = vector.broadcast %c3_i32_22 : i32 to vector<1x256xi32>
      %41 = arith.cmpi sge, %22, %40 : vector<1x256xi32>
      %c259_i32 = arith.constant 259 : i32
      %42 = vector.broadcast %c259_i32 : i32 to vector<1x256xi32>
      %43 = arith.cmpi slt, %22, %42 : vector<1x256xi32>
      %44 = arith.andi %41, %43 : vector<1x256xi1>
      %45 = vector.broadcast %23 : f32 to vector<1x256xf32>
      %46 = arith.mulf %45, %38 : vector<1x256xf32>
      %47 = vector.broadcast %30 : f32 to vector<1x256xf32>
      %48 = arith.mulf %47, %39 : vector<1x256xf32>
      %49 = arith.addf %46, %48 : vector<1x256xf32>
      %cst_23 = arith.constant 0.000000e+00 : f32
      %50 = vector.broadcast %cst_23 : f32 to vector<1x256xf32>
      %51 = arith.select %44, %49, %50 : vector<1x256xi1>, vector<1x256xf32>
      %52 = arith.addf %37, %51 : vector<1x256xf32>
      %c2_i32 = arith.constant 2 : i32
      %53 = tpu.dynamic_rotate %20 by %c2_i32 dim 1 : vector<1x256xf32>, i32 -> vector<1x256xf32>
      %c2_i32_24 = arith.constant 2 : i32
      %54 = tpu.dynamic_rotate %21 by %c2_i32_24 dim 1 : vector<1x256xf32>, i32 -> vector<1x256xf32>
      %c2_i32_25 = arith.constant 2 : i32
      %55 = vector.broadcast %c2_i32_25 : i32 to vector<1x256xi32>
      %56 = arith.cmpi sge, %22, %55 : vector<1x256xi32>
      %c258_i32 = arith.constant 258 : i32
      %57 = vector.broadcast %c258_i32 : i32 to vector<1x256xi32>
      %58 = arith.cmpi slt, %22, %57 : vector<1x256xi32>
      %59 = arith.andi %56, %58 : vector<1x256xi1>
      %60 = vector.broadcast %24 : f32 to vector<1x256xf32>
      %61 = arith.mulf %60, %53 : vector<1x256xf32>
      %62 = vector.broadcast %31 : f32 to vector<1x256xf32>
      %63 = arith.mulf %62, %54 : vector<1x256xf32>
      %64 = arith.addf %61, %63 : vector<1x256xf32>
      %cst_26 = arith.constant 0.000000e+00 : f32
      %65 = vector.broadcast %cst_26 : f32 to vector<1x256xf32>
      %66 = arith.select %59, %64, %65 : vector<1x256xi1>, vector<1x256xf32>
      %67 = arith.addf %52, %66 : vector<1x256xf32>
      %c1_i32 = arith.constant 1 : i32
      %68 = tpu.dynamic_rotate %20 by %c1_i32 dim 1 : vector<1x256xf32>, i32 -> vector<1x256xf32>
      %c1_i32_27 = arith.constant 1 : i32
      %69 = tpu.dynamic_rotate %21 by %c1_i32_27 dim 1 : vector<1x256xf32>, i32 -> vector<1x256xf32>
      %c1_i32_28 = arith.constant 1 : i32
      %70 = vector.broadcast %c1_i32_28 : i32 to vector<1x256xi32>
      %71 = arith.cmpi sge, %22, %70 : vector<1x256xi32>
      %c257_i32 = arith.constant 257 : i32
      %72 = vector.broadcast %c257_i32 : i32 to vector<1x256xi32>
      %73 = arith.cmpi slt, %22, %72 : vector<1x256xi32>
      %74 = arith.andi %71, %73 : vector<1x256xi1>
      %75 = vector.broadcast %25 : f32 to vector<1x256xf32>
      %76 = arith.mulf %75, %68 : vector<1x256xf32>
      %77 = vector.broadcast %32 : f32 to vector<1x256xf32>
      %78 = arith.mulf %77, %69 : vector<1x256xf32>
      %79 = arith.addf %76, %78 : vector<1x256xf32>
      %cst_29 = arith.constant 0.000000e+00 : f32
      %80 = vector.broadcast %cst_29 : f32 to vector<1x256xf32>
      %81 = arith.select %74, %79, %80 : vector<1x256xi1>, vector<1x256xf32>
      %82 = arith.addf %67, %81 : vector<1x256xf32>
      %c0_i32_30 = arith.constant 0 : i32
      %83 = vector.broadcast %c0_i32_30 : i32 to vector<1x256xi32>
      %84 = arith.cmpi sge, %22, %83 : vector<1x256xi32>
      %c256_i32 = arith.constant 256 : i32
      %85 = vector.broadcast %c256_i32 : i32 to vector<1x256xi32>
      %86 = arith.cmpi slt, %22, %85 : vector<1x256xi32>
      %87 = arith.andi %84, %86 : vector<1x256xi1>
      %88 = vector.broadcast %26 : f32 to vector<1x256xf32>
      %89 = arith.mulf %88, %20 : vector<1x256xf32>
      %90 = vector.broadcast %33 : f32 to vector<1x256xf32>
      %91 = arith.mulf %90, %21 : vector<1x256xf32>
      %92 = arith.addf %89, %91 : vector<1x256xf32>
      %cst_31 = arith.constant 0.000000e+00 : f32
      %93 = vector.broadcast %cst_31 : f32 to vector<1x256xf32>
      %94 = arith.select %87, %92, %93 : vector<1x256xi1>, vector<1x256xf32>
      %95 = arith.addf %82, %94 : vector<1x256xf32>
      %c255_i32 = arith.constant 255 : i32
      %96 = tpu.dynamic_rotate %20 by %c255_i32 dim 1 : vector<1x256xf32>, i32 -> vector<1x256xf32>
      %c255_i32_32 = arith.constant 255 : i32
      %97 = tpu.dynamic_rotate %21 by %c255_i32_32 dim 1 : vector<1x256xf32>, i32 -> vector<1x256xf32>
      %c-1_i32 = arith.constant -1 : i32
      %98 = vector.broadcast %c-1_i32 : i32 to vector<1x256xi32>
      %99 = arith.cmpi sge, %22, %98 : vector<1x256xi32>
      %c255_i32_33 = arith.constant 255 : i32
      %100 = vector.broadcast %c255_i32_33 : i32 to vector<1x256xi32>
      %101 = arith.cmpi slt, %22, %100 : vector<1x256xi32>
      %102 = arith.andi %99, %101 : vector<1x256xi1>
      %103 = vector.broadcast %27 : f32 to vector<1x256xf32>
      %104 = arith.mulf %103, %96 : vector<1x256xf32>
      %105 = vector.broadcast %34 : f32 to vector<1x256xf32>
      %106 = arith.mulf %105, %97 : vector<1x256xf32>
      %107 = arith.addf %104, %106 : vector<1x256xf32>
      %cst_34 = arith.constant 0.000000e+00 : f32
      %108 = vector.broadcast %cst_34 : f32 to vector<1x256xf32>
      %109 = arith.select %102, %107, %108 : vector<1x256xi1>, vector<1x256xf32>
      %110 = arith.addf %95, %109 : vector<1x256xf32>
      %c254_i32 = arith.constant 254 : i32
      %111 = tpu.dynamic_rotate %20 by %c254_i32 dim 1 : vector<1x256xf32>, i32 -> vector<1x256xf32>
      %c254_i32_35 = arith.constant 254 : i32
      %112 = tpu.dynamic_rotate %21 by %c254_i32_35 dim 1 : vector<1x256xf32>, i32 -> vector<1x256xf32>
      %c-2_i32 = arith.constant -2 : i32
      %113 = vector.broadcast %c-2_i32 : i32 to vector<1x256xi32>
      %114 = arith.cmpi sge, %22, %113 : vector<1x256xi32>
      %c254_i32_36 = arith.constant 254 : i32
      %115 = vector.broadcast %c254_i32_36 : i32 to vector<1x256xi32>
      %116 = arith.cmpi slt, %22, %115 : vector<1x256xi32>
      %117 = arith.andi %114, %116 : vector<1x256xi1>
      %118 = vector.broadcast %28 : f32 to vector<1x256xf32>
      %119 = arith.mulf %118, %111 : vector<1x256xf32>
      %120 = vector.broadcast %35 : f32 to vector<1x256xf32>
      %121 = arith.mulf %120, %112 : vector<1x256xf32>
      %122 = arith.addf %119, %121 : vector<1x256xf32>
      %cst_37 = arith.constant 0.000000e+00 : f32
      %123 = vector.broadcast %cst_37 : f32 to vector<1x256xf32>
      %124 = arith.select %117, %122, %123 : vector<1x256xi1>, vector<1x256xf32>
      %125 = arith.addf %110, %124 : vector<1x256xf32>
      %c253_i32 = arith.constant 253 : i32
      %126 = tpu.dynamic_rotate %20 by %c253_i32 dim 1 : vector<1x256xf32>, i32 -> vector<1x256xf32>
      %c253_i32_38 = arith.constant 253 : i32
      %127 = tpu.dynamic_rotate %21 by %c253_i32_38 dim 1 : vector<1x256xf32>, i32 -> vector<1x256xf32>
      %c-3_i32 = arith.constant -3 : i32
      %128 = vector.broadcast %c-3_i32 : i32 to vector<1x256xi32>
      %129 = arith.cmpi sge, %22, %128 : vector<1x256xi32>
      %c253_i32_39 = arith.constant 253 : i32
      %130 = vector.broadcast %c253_i32_39 : i32 to vector<1x256xi32>
      %131 = arith.cmpi slt, %22, %130 : vector<1x256xi32>
      %132 = arith.andi %129, %131 : vector<1x256xi1>
      %133 = vector.broadcast %29 : f32 to vector<1x256xf32>
      %134 = arith.mulf %133, %126 : vector<1x256xf32>
      %135 = vector.broadcast %36 : f32 to vector<1x256xf32>
      %136 = arith.mulf %135, %127 : vector<1x256xf32>
      %137 = arith.addf %134, %136 : vector<1x256xf32>
      %cst_40 = arith.constant 0.000000e+00 : f32
      %138 = vector.broadcast %cst_40 : f32 to vector<1x256xf32>
      %139 = arith.select %132, %137, %138 : vector<1x256xi1>, vector<1x256xf32>
      %140 = arith.addf %125, %139 : vector<1x256xf32>
      %141 = arith.negf %140 : vector<1x256xf32>
      %142 = math.exp %141 : vector<1x256xf32>
      %cst_41 = arith.constant 1.000000e+00 : f32
      %143 = vector.broadcast %cst_41 : f32 to vector<1x256xf32>
      %144 = arith.addf %143, %142 : vector<1x256xf32>
      %145 = arith.divf %143, %144 : vector<1x256xf32>
      %c0_42 = arith.constant 0 : index
      %c0_43 = arith.constant 0 : index
      %c0_44 = arith.constant 0 : index
      %146 = vector.load %arg4[%c0_42, %c0_43, %c0_44] : memref<1x1x256xf32, #tpu.memory_space<vmem>>, vector<1x1x256xf32>
      %147 = vector.shape_cast %146 : vector<1x1x256xf32> to vector<1x256xf32>
      %148 = vector.shape_cast %145 : vector<1x256xf32> to vector<1x1x256xf32>
      tpu.vector_store %arg4[%c0_42, %c0_43, %c0_44], %148 {strides = array<i32>} : memref<1x1x256xf32, #tpu.memory_space<vmem>>, vector<1x1x256xf32>,
    } else {
    }
    return
  }
  func.func @transform_0(%arg0: i32, %arg1: i32) -> (i32, i32, i32) {
    %c0_i32 = arith.constant 0 : i32
    %c0_i32_0 = arith.constant 0 : i32
    return %arg0, %arg1, %c0_i32 : i32, i32, i32
  }
  func.func @transform_1(%arg0: i32, %arg1: i32) -> i32 {
    %c0_i32 = arith.constant 0 : i32
    %c0_i32_0 = arith.constant 0 : i32
    return %c0_i32 : i32
  }
  func.func @transform_2(%arg0: i32, %arg1: i32) -> (i32, i32, i32) {
    %c0_i32 = arith.constant 0 : i32
    %c0_i32_0 = arith.constant 0 : i32
    %c0_i32_1 = arith.constant 0 : i32
    return %arg0, %c0_i32, %c0_i32_0 : i32, i32, i32
  }
}

</mosaic_0001>

<bundles_post_ra>
// kernel: tpu_custom_call.1
= control target key start
LH: loop header
LB: loop body
LE: loop exit
PB: predicated region body
PF: predicated region fallthrough
CT: control target
= control target key end

     0   :  { %7 = vsyncpa [#allocation5], 0  ;;  %s1210_s0 = inlined_call_operand.hbm [shape: f32[2,8,256], index: 0, kind: input, shape index: {}]   ;;  %s1211_s1 = inlined_call_operand.hbm [shape: f32[14], index: 1, kind: input, shape index: {}]   ;;  %s1212_s2 = inlined_call_operand.hbm [shape: f32[2,1,256], index: 2, kind: output, shape index: {}]  }
   0x1   :  { %9 = vsyncpa [#allocation5 + $0x1], 0 }
   0x2   :  { %10 = vsyncpa [#allocation7], 0 }
   0x3   :  { %11 = vsyncpa [#allocation6], 0 }
   0x4   :  { %13 = vsyncpa [#allocation6 + $0x1], 0  ;;  %s919_s9 = smov 0   ;;  %s921_s10 = smov 0  }
   0x5   :  { %s923_s11 = smov 0   ;;  %s925_s12 = smov 0  }
   0x6   :  { %s927_s13 = smov 0   ;;  %s929_s14 = smov 0  }
   0x7 LB: > { %s641_s15 = sadd.s32 4294967295, %s893_s14   ;;  %s642_s16 = sadd.s32 4294967294, %s893_s14   ;;  %s893_s14 = sphi %s929_s14, %s19_s14   ;;  %s889_s13 = sphi %s927_s13, %s1228_s13   ;;  %s885_s12 = sphi %s925_s12, %s1227_s12   ;;  %s881_s11 = sphi %s923_s11, %s1226_s11   ;;  %s877_s10 = sphi %s921_s10, %s1225_s10   ;;  %s873_s9 = sphi %s919_s9, %s1224_s9  }
   0x8   : > { %p53_p0 = scmp.ne.s32.totalorder %s877_s10, %s873_s9  ;;  %p953_p1 = scmp.eq.s32.totalorder %s641_s15, 0 }
   0x9   : > { %p957_p2 = scmp.eq.s32.totalorder %s641_s15, 1  ;;  %p104_p3 = scmp.eq.s32.totalorder %s642_s16, 1 }
   0xa   : > { %p963_p4 = por %p953_p1, %p53_p0  ;;  %p643_p5 = scmp.ge.s32.totalorder %s893_s14, 1 }
   0xb   : > { %p968_p6 = por %p104_p3, %p53_p0  ;;  %p111_p7 = scmp.lt.s32.totalorder %s893_s14, 3 }
   0xc   : > { %s123_s23 = sshll.u32 %s1211_s1, 4  ;;  %s31_s25 = sadd.s32 1, %s889_s13  ;;  %s124_s23 = int_to_ptr.hbm [resolvable:$true] %s123_s23 }
   0xd   : > { %p976_p8 = pnand %p643_p5, %p111_p7  ;;  %s40_s26 = sadd.s32 1, %s881_s11 }
   0xe   : > { %p33_p12 = scmp.ge.s32.totalorder %s31_s25, 2  ;;  %s895_s27 = smov [#allocation8]  }
   0xf   : > { %p681_p10 = pneg %p976_p8  ;;  %p47_p13 = scmp.ne.s32.totalorder %s881_s11, %s877_s10 }
  0x10   : > { %s1230_s25 = smov (%p33_p12, %s31_s25), 0  ;;  %p48_p0 = scmp.eq.s32.totalorder %s893_s14, 0 }
  0x11   : > { %p682_p11 = pnand %p681_p10, %p953_p1  ;;  %s35_s28 = ssub.s32 %s889_s13, %s1230_s25 }
  0x12   : > { %p694_p3 = scmp.lt.s32.totalorder %s893_s14, 2  ;;  %p38_p5 = scmp.eq.s32.totalorder %s35_s28, 0 }
  0x13   : > { %684 = dma.hbm_to_smem (!%p682_p11), %s124_s23, 16, %s895_s27, [#allocation7]  }
  0x14   : > { %p49_p7 = por %p48_p0, %p47_p13  ;;  %p997_p9 = por %p957_p2, %p47_p13 }
  0x15   : > { %s134_s30 = sand.u32 1, %s881_s11   ;;  %s672_s5 = sshll.u32 %s889_s13, 4 }
  0x16   : > { %s1003_s3 = scalar_select %p38_p5, %s881_s11, %s40_s26  }
  0x17   : > { %s646_s4 = sshll.u32 %s134_s30, 4  ;;  %s145_s8 = scalar_lea.hbm %s1210_s0, %s672_s5 }
  0x18   : > { %s138_s15 = scalar_lea.vmem [#allocation4], %s646_s4  ;;  %s147_s21 = sshll.u32 %s145_s8, 4  ;;  %s148_s21 = int_to_ptr.hbm [resolvable:$true] %s147_s21 }
  0x19   : > { %s149_s16 = sshll.u32 %s138_s15, 4  ;;  %p686_p10 = pnand %p694_p3, %p49_p7  ;;  %s150_s16 = int_to_ptr.vmem [resolvable:$true] %s149_s16 }
  0x1a   : > { %s135_s18 = scalar_lea.sflag [#allocation5], %s134_s30  ;;  %158 = sbr.rel (%p976_p8) target bundleno = 277 (0x115), region = 28 }
  0x1b   : > { %688 = dma.hbm_to_vmem [thread:$0]  (!%p686_p10), %s148_s21, 256, %s150_s16, %s135_s18  }
  0x1c   : > { %s1014_s22 = sand.u32 (!%p976_p8), 1, %s877_s10  }
  0x1d   : > { %s650_s23 = sshll.u32 (!%p976_p8), %s1014_s22, 4  ;;  %s161_s26 = scalar_lea.sflag (!%p976_p8), [#allocation5], %s1014_s22 }
  0x1e   : > { %s164_s27 = scalar_lea.vmem (!%p976_p8), [#allocation4], %s650_s23 }
  0x1f   : > { %860 = dma.done.wait (%p963_p4), %s161_s26, 256  }
  0x20   : > { %862 = vsyncadd (%p963_p4), %s161_s26, 4294967040 }
  0x21   : > { %864 = dma.done.wait (%p953_p1), [#allocation7], 16  }
  0x22   : > { %866 = vsyncadd (%p953_p1), [#allocation7], 4294967280 }
  0x23   : > { %175 = sfence }
  0x24   : > { %v196_v0 = vlaneseq  ;;  %v202_v1 = vld [vmem:[%s164_s27] sm:$0xff]  ;;  %v203_v2 = vld [vmem:[%s164_s27 + $0x8] sm:$0xff]  ;;  %v896_v6 = vmov -inf   ;;  %v897_v11 = vmov 0.0   ;;  %vm220_vm1 = vcmask 1040384   ;;  %s898_s17 = smov 2  }
  0x25   : > { %v205_v3 = vrot.slane %v202_v1, 4  ;;  %v211_v4 = vrot.slane %v203_v2, 4  ;;  %s899_s19 = smov 3   ;;  %s900_s24 = smov 1  }
  0x26   : > { %vm1027_vm0 = vcmp.lt.s32.totalorder %v196_v0, 256  ;;  %s901_s28 = smov 127   ;;  %s902_s30 = smov 126   ;;  %v1066_v56 = vand.u32 127, %v196_v0 }
  0x27   : > { %201 = vst.msk [vmem:[#allocation3] sm:$0x3] %vm1027_vm0, %v896_v6  ;;  %v231_v7 = vmax.f32 %v202_v1, %v205_v3  ;;  %v237_v8 = vmax.f32 %v203_v2, %v211_v4  ;;  %v206_v9 = vadd.f32 %v205_v3, %v202_v1  ;;  %v212_v10 = vadd.f32 %v211_v4, %v203_v2  ;;  %s903_s4 = smov 125   ;;  %s1051_s5 = sld [smem:[#allocation8 + $0x7]] }
  0x28   : > { %200 = vst.msk [vmem:[#allocation2] sm:$0x3] %vm1027_vm0, %v897_v11  ;;  %s1053_s6 = sld [smem:[#allocation8 + $0x1]]  ;;  %vm281_vm2 = vcmp.lt.s32.totalorder %v1066_v56, 3  ;;  %vm317_vm3 = vcmp.lt.s32.totalorder %v1066_v56, 2  ;;  %vm348_vm4 = vcmp.lt.s32.totalorder %v1066_v56, 1 }
  0x29   : > { %v232_v12 = vrot.slane %v231_v7, 2  ;;  %v238_v13 = vrot.slane %v237_v8, 2  ;;  %v207_v14 = vrot.slane %v206_v9, 2  ;;  %v213_v15 = vrot.slane %v212_v10, 2  ;;  %s1055_s7 = sld [smem:[#allocation8 + $0x8]] }
  0x2a   : > { %s1057_s8 = sld [smem:[#allocation8]]  ;;  %vm326_vm5 = vcmp.ge.s32.totalorder %v1066_v56, 2  ;;  %vm295_vm6 = vcmp.ge.s32.totalorder %v1066_v56, 3  ;;  %vm357_vm7 = vcmp.ge.s32.totalorder %v1066_v56, 1  ;;  %vm399_vm8 = vcmp.lt.s32.totalorder %v1066_v56, 127 }
  0x2b   : > { %v233_v16 = vmax.f32 %v231_v7, %v232_v12  ;;  %v239_v17 = vmax.f32 %v237_v8, %v238_v13  ;;  %v208_v18 = vadd.f32 %v207_v14, %v206_v9  ;;  %v214_v19 = vadd.f32 %v213_v15, %v212_v10  ;;  %s1059_s15 = sld [smem:[#allocation8 + $0x9]] }
  0x2c   : > { %s1063_s16 = sld [smem:[#allocation8 + $0x2]]  ;;  %vm430_vm9 = vcmp.lt.s32.totalorder %v1066_v56, 126  ;;  %vm461_vm12 = vcmp.lt.s32.totalorder %v1066_v56, 125 }
  0x2d   : > { %v234_v20 = vrot.slane %v233_v16, 1  ;;  %v240_v21 = vrot.slane %v239_v17, 1  ;;  %v209_v22 = vrot.slane %v208_v18, 1  ;;  %v215_v23 = vrot.slane %v214_v19, 1  ;;  %s655_s21 = sld [smem:[#allocation8 + $0x3]] }
  0x2e   : > { %v229_v28 = vld [vmem:[#allocation3] sm:$0x3]  ;;  %s662_s18 = sld [smem:[#allocation8 + $0xa]]  ;;  %v304_v63 = vstv %s1051_s5  ;;  %v332_v0 = vstv %s1053_s6 }
  0x2f   : > { %v235_v24 = vmax.f32 %v233_v16, %v234_v20  ;;  %v241_v25 = vmax.f32 %v239_v17, %v240_v21  ;;  %v210_v26 = vadd.f32 %v209_v22, %v208_v18  ;;  %v216_v27 = vadd.f32 %v215_v23, %v214_v19  ;;  %v204_v30 = vld [vmem:[#allocation2] sm:$0x3]  ;;  %s1096_s23 = sld [smem:[#allocation8 + $0x4]] }
  0x30   : > { %v335_v57 = vstv %s1055_s7  ;;  %v301_v59 = vstv %s1057_s8  ;;  %s1098_s26 = sld [smem:[#allocation8 + $0xb]] }
  0x31   : > { %v244_v29 = vrot.slane %v241_v25, 7  ;;  %v219_v31 = vrot.slane %v216_v27, 7  ;;  %v366_v1 = vstv %s1059_s15  ;;  %s1102_s27 = sld [smem:[#allocation8 + $0x5]]  ;;  %s533_s15 = scalar_lea.sflag [#allocation6], %s1014_s22 }
  0x32   : > { %v363_v2 = vstv %s1063_s16 }
  0x33   : > { %v245_v32 = vsel %vm220_vm1, %v235_v24, %v244_v29  ;;  %v221_v33 = vsel %vm220_vm1, %v210_v26, %v219_v31  ;;  %v381_v6 = vstv %s655_s21 }
  0x34   : > { %v247_v34 = vmax.f32 %v229_v28, %v245_v32  ;;  %v223_v35 = vadd.f32 %v221_v33, %v204_v30  ;;  %v383_v7 = vstv %s662_s18 }
  0x36   : > { %248 = vst.msk [vmem:[#allocation3] sm:$0x3] %vm1027_vm0, %v247_v34 }
  0x37   : > { %228 = vst.msk [vmem:[#allocation2] sm:$0x3] %vm1027_vm0, %v223_v35 }
  0x3d   : > { %v1041_v36 = vld [vmem:[#allocation3] sm:$0x3] }
  0x3e   : > { %v285_v37 = vperm.slane %v1041_v36, 0  ;;  %v252_v38 = vld [vmem:[#allocation2] sm:$0x3]  ;;  %v286_v39 = vperm.slane %v1041_v36, 1  ;;  %v384_v16 = vmul.f32 %v383_v7, %v1041_v36 }
  0x3f   : > { %v1045_v40 = vmul.f32 0.125, %v252_v38 }
  0x40   : > { %320 = vrot.lane.b32.xlu0 %v285_v37, %s898_s17  ;;  %289 = vrot.lane.b32.xlu1 %v285_v37, %s899_s19 }
  0x41   : > { %353 = vrot.lane.b32.xlu2 %v286_v39, %s900_s24  ;;  %v273_v41 = vperm.slane %v1045_v40, 0  ;;  %v274_v42 = vperm.slane %v1045_v40, 1  ;;  %v382_v15 = vmul.f32 %v381_v6, %v1045_v40  ;;  %v417_v40 = vstv %s1098_s26  ;;  %s827_s26 = scalar_lea.hbm %s1212_s2, 4 }
  0x43   : > { %v385_v33 = vadd.f32 %v384_v16, %v382_v15 }
  0x45   : > { %v388_v6 = vperm.slane %v385_v33, 1 }
  0x48   : > { %291 = vrot.lane.b32.xlu1 %v286_v39, %s899_s19  ;;  %277 = vrot.lane.b32.xlu0 %v273_v41, %s899_s19 }
  0x49   : > { %313 = vrot.lane.b32.xlu2 %v273_v41, %s898_s17 }
  0x50   : > { %322 = vrot.lane.b32.xlu1 %v286_v39, %s898_s17  ;;  %279 = vrot.lane.b32.xlu0 %v274_v42, %s899_s19  ;;  %s1136_s19 = sld [smem:[#allocation8 + $0xd]] }
  0x51   : > { %315 = vrot.lane.b32.xlu2 %v274_v42, %s898_s17  ;;  %s1108_s17 = sld [smem:[#allocation8 + $0xc]] }
  0x58   : > { %351 = vrot.lane.b32.xlu1 %v285_v37, %s900_s24  ;;  %346 = vrot.lane.b32.xlu0 %v274_v42, %s900_s24 }
  0x59   : > { %344 = vrot.lane.b32.xlu2 %v273_v41, %s900_s24  ;;  %s1149_s24 = sld [smem:[#allocation8 + $0x6]] }
  0x60   : > { %397 = vrot.lane.b32.xlu1 %v274_v42, %s901_s28  ;;  %395 = vrot.lane.b32.xlu0 %v273_v41, %s901_s28 }
  0x61   : > { %402 = vrot.lane.b32.xlu2 %v285_v37, %s901_s28 }
  0x68   : > { %426 = vrot.lane.b32.xlu1 %v273_v41, %s902_s30  ;;  %404 = vrot.lane.b32.xlu0 %v286_v39, %s901_s28  ;;  %s652_s28 = sshll.u32 %s1014_s22, 1 }
  0x69   : > { %428 = vrot.lane.b32.xlu2 %v274_v42, %s902_s30 }
  0x70   : > { %435 = vrot.lane.b32.xlu1 %v286_v39, %s902_s30  ;;  %433 = vrot.lane.b32.xlu0 %v285_v37, %s902_s30  ;;  %s669_s30 = sshll.u32 %s885_s12, 1  ;;  %s191_s12 = scalar_lea.vmem [#allocation9], %s652_s28 }
  0x71   : > { %457 = vrot.lane.b32.xlu2 %v273_v41, %s903_s4  ;;  %s543_s6 = scalar_lea.hbm %s1212_s2, %s669_s30  ;;  %s545_s7 = sshll.u32 %s191_s12, 4  ;;  %s546_s7 = int_to_ptr.vmem [resolvable:$true] %s545_s7 }
  0x72   : > { %s547_s8 = sshll.u32 %s543_s6, 4  ;;  %s548_s8 = int_to_ptr.hbm [resolvable:$true] %s547_s8 }
  0x73   : > { %s821_s16 = sshra.s32 %s548_s8, 4  ;;  %s822_s16 = int_to_ptr.hbm [resolvable:$true] %s821_s16 }
  0x74   : > { %s823_s21 = scalar_lea.hbm %s822_s16, 2  ;;  %p828_p8 = scmp.lt.s32.totalorder %s822_s16, %s1212_s2 }
  0x75   : > { %p824_p1 = scmp.ne.s32.totalorder %s822_s16, %s823_s21  ;;  %p829_p11 = scmp.lt.s32.totalorder %s827_s26, %s823_s21 }
  0x77   : > { %p825_p2 = pnand %p824_p1, %p997_p9  ;;  %p830_p12 = por %p829_p11, %p828_p8 }
  0x78   : > { %464 = vrot.lane.b32.xlu1 %v285_v37, %s903_s4  ;;  %459 = vrot.lane.b32.xlu0 %v274_v42, %s903_s4 }
  0x79   : > { %466 = vrot.lane.b32.xlu2 %v286_v39, %s903_s4  ;;  %v414_v39 = vstv %s1096_s23  ;;  %p826_p4 = pneg %p825_p2 }
  0x7b   : > { %p831_p13 = pnand %p830_p12, %p826_p4 }
  0x9b   : > { %v1049_v43 = vpop.permute.xlu2 %353 }
  0xa3   : > { %v314_v44 = vpop.permute.xlu2 %313 }
  0xab   : > { %v316_v47 = vpop.permute.xlu2 %315 }
  0xac   : > { %v319_v4 = vsel %vm317_vm3, %v316_v47, %v314_v44  ;;  %v318_v22 = vsel %vm317_vm3, %v314_v44, %v316_v47 }
  0xad   : > { %v333_v14 = vmul.f32 %v332_v0, %v319_v4  ;;  %v334_v32 = vmul.f32 %v332_v0, %v318_v22 }
  0xb2   : > { %v321_v45 = vpop.permute.xlu0 %320  ;;  %v290_v46 = vpop.permute.xlu1 %289 }
  0xb3   : > { %v345_v50 = vpop.permute.xlu2 %344 }
  0xba   : > { %v292_v48 = vpop.permute.xlu1 %291  ;;  %v278_v49 = vpop.permute.xlu0 %277 }
  0xbb   : > { %v1061_v53 = vpop.permute.xlu2 %402  ;;  %v294_v3 = vsel %vm281_vm2, %v292_v48, %v290_v46  ;;  %v293_v21 = vsel %vm281_vm2, %v290_v46, %v292_v48  ;;  %v445_v48 = vstv %s1102_s27 }
  0xbc   : > { %v305_v13 = vmul.f32 %v304_v63, %v294_v3  ;;  %v306_v31 = vmul.f32 %v304_v63, %v293_v21 }
  0xc2   : > { %v323_v51 = vpop.permute.xlu1 %322  ;;  %v280_v52 = vpop.permute.xlu0 %279 }
  0xc3   : > { %v325_v58 = vsel %vm317_vm3, %v323_v51, %v321_v45  ;;  %v283_v60 = vsel %vm281_vm2, %v280_v52, %v278_v49  ;;  %v1089_v8 = vpop.permute.xlu2 %428  ;;  %v324_v17 = vsel %vm317_vm3, %v321_v45, %v323_v51  ;;  %v282_v18 = vsel %vm281_vm2, %v278_v49, %v280_v52 }
  0xc4   : > { %v336_v9 = vmul.f32 %v335_v57, %v325_v58  ;;  %v302_v10 = vmul.f32 %v301_v59, %v283_v60  ;;  %v337_v29 = vmul.f32 %v335_v57, %v324_v17  ;;  %v303_v30 = vmul.f32 %v301_v59, %v282_v18 }
  0xc5   : > { %v448_v49 = vstv %s1108_s17  ;;  %v479_v18 = vstv %s1136_s19 }
  0xc6   : > { %v338_v23 = vadd.f32 %v336_v9, %v333_v14  ;;  %v307_v24 = vadd.f32 %v305_v13, %v302_v10  ;;  %v339_v42 = vadd.f32 %v337_v29, %v334_v32 }
  0xc8   : > { %v340_v35 = vsel %vm326_vm5, %v338_v23, 0.0  ;;  %v309_v36 = vsel %vm295_vm6, %v307_v24, 0.0 }
  0xc9   : > { %v342_v46 = vadd.f32 %v340_v35, %v309_v36 }
  0xca   : > { %v352_v54 = vpop.permute.xlu1 %351  ;;  %v347_v55 = vpop.permute.xlu0 %346 }
  0xcb   : > { %v356_v11 = vsel %vm348_vm4, %v1049_v43, %v352_v54  ;;  %v350_v12 = vsel %vm348_vm4, %v347_v55, %v345_v50  ;;  %v355_v25 = vsel %vm348_vm4, %v352_v54, %v1049_v43  ;;  %v349_v26 = vsel %vm348_vm4, %v345_v50, %v347_v55  ;;  %v458_v41 = vpop.permute.xlu2 %457 }
  0xcc   : > { %v367_v19 = vmul.f32 %v366_v1, %v356_v11  ;;  %v364_v20 = vmul.f32 %v363_v2, %v350_v12  ;;  %v368_v37 = vmul.f32 %v366_v1, %v355_v25  ;;  %v365_v38 = vmul.f32 %v363_v2, %v349_v26 }
  0xcd   : > { %v308_v43 = vadd.f32 %v306_v31, %v303_v30  ;;  %v257_v54 = vadd.s32 128, %v1066_v56  ;;  %v387_v55 = vperm.slane %v385_v33, 0 }
  0xce   : > { %v369_v34 = vadd.f32 %v367_v19, %v364_v20  ;;  %v370_v50 = vadd.f32 %v368_v37, %v365_v38  ;;  %v476_v19 = vstv %s1149_s24 }
  0xcf   : > { %v343_v63 = vadd.f32 %v339_v42, %v308_v43  ;;  %vm411_vm10 = vcmp.lt.s32.totalorder %v257_v54, 255  ;;  %vm442_vm11 = vcmp.lt.s32.totalorder %v257_v54, 254  ;;  %vm473_vm13 = vcmp.lt.s32.totalorder %v257_v54, 253 }
  0xd0   : > { %v371_v47 = vsel %vm357_vm7, %v369_v34, 0.0 }
  0xd1   : > { %v373_v0 = vadd.f32 %v371_v47, %v342_v46  ;;  %v374_v7 = vadd.f32 %v370_v50, %v343_v63 }
  0xd2   : > { %v1077_v61 = vpop.permute.xlu1 %397  ;;  %v1079_v62 = vpop.permute.xlu0 %395 }
  0xd3   : > { %v400_v51 = vsel %vm399_vm8, %v1079_v62, %v1077_v61  ;;  %v401_v52 = vsel %vm399_vm8, %v1077_v61, %v1079_v62  ;;  %v393_v15 = vadd.f32 %v387_v55, %v373_v0  ;;  %v467_v16 = vpop.permute.xlu2 %466  ;;  %v394_v17 = vadd.f32 %v388_v6, %v374_v7 }
  0xd4   : > { %v415_v62 = vmul.f32 %v414_v39, %v400_v51  ;;  %v416_v2 = vmul.f32 %v414_v39, %v401_v52 }
  0xda   : > { %v427_v27 = vpop.permute.xlu1 %426  ;;  %v405_v28 = vpop.permute.xlu0 %404 }
  0xdb   : > { %v406_v44 = vsel %vm399_vm8, %v1061_v53, %v405_v28  ;;  %v407_v45 = vsel %vm399_vm8, %v405_v28, %v1061_v53  ;;  %v432_v53 = vsel %vm430_vm9, %v1089_v8, %v427_v27  ;;  %v431_v9 = vsel %vm430_vm9, %v427_v27, %v1089_v8 }
  0xdc   : > { %v418_v57 = vmul.f32 %v417_v40, %v406_v44  ;;  %v419_v58 = vmul.f32 %v417_v40, %v407_v45  ;;  %v447_v3 = vmul.f32 %v445_v48, %v432_v53  ;;  %v446_v14 = vmul.f32 %v445_v48, %v431_v9 }
  0xde   : > { %v420_v10 = vadd.f32 %v418_v57, %v415_v62  ;;  %v421_v11 = vadd.f32 %v419_v58, %v416_v2 }
  0xe0   : > { %v423_v20 = vsel %vm411_vm10, %v421_v11, 0.0  ;;  %v424_v21 = vadd.f32 %v420_v10, %v393_v15 }
  0xe1   : > { %v425_v33 = vadd.f32 %v423_v20, %v394_v17 }
  0xe2   : > { %v436_v59 = vpop.permute.xlu1 %435  ;;  %v434_v60 = vpop.permute.xlu0 %433 }
  0xe3   : > { %v437_v1 = vsel %vm430_vm9, %v434_v60, %v436_v59  ;;  %v438_v61 = vsel %vm430_vm9, %v436_v59, %v434_v60 }
  0xe4   : > { %v450_v4 = vmul.f32 %v448_v49, %v438_v61  ;;  %v449_v12 = vmul.f32 %v448_v49, %v437_v1 }
  0xe6   : > { %v452_v13 = vadd.f32 %v450_v4, %v447_v3  ;;  %v451_v22 = vadd.f32 %v449_v12, %v446_v14 }
  0xe8   : > { %v454_v23 = vsel %vm442_vm11, %v452_v13, 0.0  ;;  %v455_v56 = vadd.f32 %v451_v22, %v424_v21 }
  0xe9   : > { %v456_v36 = vadd.f32 %v454_v23, %v425_v33 }
  0xea   : > { %v465_v24 = vpop.permute.xlu1 %464  ;;  %v460_v8 = vpop.permute.xlu0 %459 }
  0xeb   : > { %v468_v25 = vsel %vm461_vm12, %v465_v24, %v467_v16  ;;  %v469_v26 = vsel %vm461_vm12, %v467_v16, %v465_v24  ;;  %v462_v27 = vsel %vm461_vm12, %v458_v41, %v460_v8  ;;  %v463_v28 = vsel %vm461_vm12, %v460_v8, %v458_v41 }
  0xec   : > { %v480_v29 = vmul.f32 %v479_v18, %v468_v25  ;;  %v481_v30 = vmul.f32 %v479_v18, %v469_v26  ;;  %v477_v31 = vmul.f32 %v476_v19, %v462_v27  ;;  %v478_v32 = vmul.f32 %v476_v19, %v463_v28 }
  0xee   : > { %v482_v34 = vadd.f32 %v480_v29, %v477_v31  ;;  %v483_v35 = vadd.f32 %v481_v30, %v478_v32 }
  0xf0   : > { %v485_v37 = vsel %vm473_vm13, %v483_v35, 0.0  ;;  %v486_v38 = vadd.f32 %v482_v34, %v455_v56 }
  0xf1   : > { %v487_v39 = vadd.f32 %v485_v37, %v456_v36 }
  0xf2   : > { %v666_v40 = vmul.f32 -1.442695, %v486_v38 }
  0xf3   : > { %v667_v42 = vmul.f32 -1.442695, %v487_v39 }
  0xf4   : > { %754 = vpow2.f32 %v666_v40 }
  0xf5   : > { %756 = vpow2.f32 %v667_v42 }
  0xfa   : > { %v755_v41 = vpop.eup %754 }
  0xfb   : > { %v757_v43 = vpop.eup %756  ;;  %v494_v44 = vadd.f32 1.0, %v755_v41 }
  0xfc   : > { %v495_v45 = vadd.f32 1.0, %v757_v43 }
  0xfd   : > { %758 = vrcp.f32 %v494_v44  ;;  %vm501_vm2 = vweird.f32 %v494_v44  ;;  %v507_v58 = vand.u32 2147483648, %v494_v44  ;;  %v505_v60 = vand.u32 2147483647, %v494_v44 }
  0xfe   : > { %760 = vrcp.f32 %v495_v45  ;;  %v522_v53 = vand.u32 2147483648, %v495_v45  ;;  %v520_v55 = vand.u32 2147483647, %v495_v45  ;;  %vm516_vm4 = vweird.f32 %v495_v45 }
  0xff   : > { %v508_v62 = vor.u32 1.1754944e-38, %v507_v58  ;;  %vm506_vm7 = vcmp.eq.f32.partialorder %v505_v60, 8.507059e+37 }
 0x100   : > { %v523_v0 = vor.u32 1.1754944e-38, %v522_v53  ;;  %vm521_vm6 = vcmp.eq.f32.partialorder %v520_v55, 8.507059e+37 }
 0x103   : > { %v759_v46 = vpop.eup %758 }
 0x104   : > { %v761_v47 = vpop.eup %760  ;;  %v497_v48 = vmul.f32 %v759_v46, %v494_v44  ;;  %vm502_vm14 = vweird.f32 %v759_v46 }
 0x105   : > { %v512_v49 = vmul.f32 %v761_v47, %v495_v45  ;;  %vm517_vm15 = vweird.f32 %v761_v47  ;;  %vm1167_vm3 = vmor %vm501_vm2, %vm502_vm14 }
 0x106   : > { %v498_v50 = vsub.f32 1.0, %v497_v48  ;;  %vm518_vm5 = vmor %vm516_vm4, %vm517_vm15 }
 0x107   : > { %v513_v51 = vsub.f32 1.0, %v512_v49 }
 0x108   : > { %v499_v52 = vmul.f32 %v759_v46, %v498_v50 }
 0x109   : > { %v514_v54 = vmul.f32 %v761_v47, %v513_v51 }
 0x10a   : > { %v500_v57 = vadd.f32 %v759_v46, %v499_v52 }
 0x10b   : > { %v515_v63 = vadd.f32 %v761_v47, %v514_v54 }
 0x10c   : > { %v504_v1 = vsel %vm1167_vm3, %v759_v46, %v500_v57 }
 0x10d   : > { %v519_v61 = vsel %vm518_vm5, %v761_v47, %v515_v63  ;;  %v509_v4 = vsel %vm506_vm7, %v508_v62, %v504_v1 }
 0x10e   : > { %v524_v2 = vsel %vm521_vm6, %v523_v0, %v519_v61 }
 0x10f   : > { %v528_v3 = vrot.slane %v524_v2, 7 }
 0x111   : > { %v529_v6 = vsel %vm220_vm1, %v509_v4, %v528_v3 }
 0x112   : > { %531 = vst.msk [vmem:[%s191_s12] sm:$0x3] %vm1027_vm0, %v529_v6 }
 0x113   : > { %834 = shalt.err (!%p831_p13)
}
 0x114   : > { %679 = dma.vmem_to_hbm [thread:$0]  (%p997_p9), %s546_s7, 32, %s548_s8, %s533_s15  }
 0x115 PF: > { %s559_s22 = sand.u32 1, %s873_s9   ;;  %p1223_p0 = scmp.ge.s32.totalorder %s893_s14, 2 }
 0x116   : > { %s560_s19 = scalar_lea.sflag [#allocation6], %s559_s22 }
 0x117   : > { %p690_p3 = pnand %p1223_p0, %p968_p6 }
 0x119   : > { %p691_p5 = pneg %p690_p3 }
 0x11b   : > { %868 = dma.done.wait (%p691_p5), %s560_s19, 32  }
 0x11c   : > { %870 = vsyncadd (%p691_p5), %s560_s19, 4294967264  ;;  %s19_s14 = sadd.s32 1, %s893_s14   ;;  %s1224_s9 = smov %s877_s10 }
 0x11d   : > { %p16_p7 = scmp.ge.s32.totalorder %s19_s14, 4   ;;  %s1225_s10 = smov %s881_s11 }
 0x11e   : > { %s1226_s11 = smov %s1003_s3  ;;  %s1227_s12 = smov %s889_s13 }
 0x11f   : > { %s1228_s13 = smov %s1230_s25  ;;  %18 = sbr.rel (!%p16_p7) target bundleno = 7 (0x7), region = 86 }
 0x124   :  { %566 = vsyncpa [#allocation5], 1 }
 0x125   :  { %568 = vsyncpa [#allocation5 + $0x1], 1 }
 0x126   :  { %569 = vsyncpa [#allocation6], 1 }
 0x127   :  { %571 = vsyncpa [#allocation6 + $0x1], 1 }
 0x128   :  { %572 = vsyncpa [#allocation7], 1 }
 0x129   :  { %574 = vsyncpa [#allocation7 + $0x1], 1 }

</bundles_post_ra>
